<compile_context>
chip_gen: v7x
topology: tpu7x:2x2x1
jax: 0.10.0
libtpu: 0.0.40
codegen_flags: <defaults>
</compile_context>

<pallas_src>
import functools
import math

import jax
import jax.numpy as jnp
from jax.experimental import pallas as pl
from jax.experimental.pallas import tpu as pltpu


# ----------------------------------------------------------------------------
# Kernels (operate on lane-dense, flattened [B, S*D] blocks)
# ----------------------------------------------------------------------------
def _pe_add_kernel(x_ref, pe_ref, o_ref):
    """y = x + pe   (pe block is [1, TSD], broadcast over batch)."""
    o_ref[...] = x_ref[...] + pe_ref[...]


def _pe_add_dropout_kernel(x_ref, pe_ref, mask_ref, o_ref, *, scale):
    """y = dropout(x + pe): keep where mask != 0, scale kept values by 1/(1-p)."""
    y = x_ref[...] + pe_ref[...]
    # int8 -> int32 widen before the compare (widely supported lowering path).
    keep = mask_ref[...].astype(jnp.int32) != 0
    scale_c = jnp.asarray(scale, dtype=y.dtype)
    zero_c = jnp.zeros((), dtype=y.dtype)
    o_ref[...] = jnp.where(keep, y * scale_c, zero_c)


# ----------------------------------------------------------------------------
# Host-side PE table (same construction as the PyTorch buffer)
# ----------------------------------------------------------------------------
def make_positional_encoding_table(max_len, d_model, dtype=jnp.float32):
    position = jnp.arange(max_len, dtype=jnp.float32)[:, None]
    div_term = jnp.exp(
        jnp.arange(0, d_model, 2, dtype=jnp.float32) * (-(math.log(10000.0) / d_model))
    )
    angles = position * div_term[None, :]                 # [max_len, d_model//2]
    pe = jnp.zeros((max_len, d_model), jnp.float32)
    pe = pe.at[:, 0::2].set(jnp.sin(angles))
    pe = pe.at[:, 1::2].set(jnp.cos(angles))
    return pe.astype(dtype)


# ----------------------------------------------------------------------------
# Wrapper
# ----------------------------------------------------------------------------
def positional_encoding(x, pe_table, *, dropout_p=0.1, training=False, rng_key=None,
                        target_block_bytes=2 * 1024 * 1024,
                        fast_path_bytes=4 * 1024 * 1024):
    """Pallas implementation of PositionalEncoding.forward.

    x:        [B, S, d_model]
    pe_table: [max_len, d_model] (max_len >= S)
    returns:  [B, S, d_model], same dtype as x
    """
    B, S, D = x.shape
    assert pe_table.shape[1] == D and pe_table.shape[0] >= S
    SD = S * D
    itemsize = jnp.dtype(x.dtype).itemsize

    # Lane-dense flattened layout (free reshapes): last dim S*D >> 128 so
    # loads/stores are unmasked even when d_model < 128.
    x2 = x.reshape(B, SD)
    pe2 = pe_table[:S].astype(x.dtype).reshape(1, SD)

    apply_dropout = bool(training) and float(dropout_p) > 0.0
    inputs = [x2, pe2]
    if apply_dropout:
        if rng_key is None:
            rng_key = jax.random.PRNGKey(0)
        keep = jax.random.bernoulli(rng_key, 1.0 - float(dropout_p), (B, SD))
        inputs.append(keep.astype(jnp.int8))               # 1 byte/elem mask stream
        scale = 1.0 / (1.0 - float(dropout_p)) if dropout_p < 1.0 else 0.0
        kernel = functools.partial(_pe_add_dropout_kernel, scale=float(scale))
    else:
        kernel = _pe_add_kernel

    bytes_accessed = (2 * B * SD + SD) * itemsize + (B * SD if apply_dropout else 0)
    cost = pl.CostEstimate(
        flops=B * SD * (2 if apply_dropout else 1),
        transcendentals=0,
        bytes_accessed=bytes_accessed,
    )
    out_shape = jax.ShapeDtypeStruct((B, SD), x.dtype)

    # --- Single-block fast path: whole arrays in VMEM, no grid/pipeline. ---
    if B * SD * itemsize <= fast_path_bytes:
        out2 = pl.pallas_call(kernel, out_shape=out_shape, cost_estimate=cost)(*inputs)
        return out2.reshape(B, S, D)

    # --- Tiled path: tile only the flattened seq*D axis, full batch per block. ---
    # Block sized by bytes (~target_block_bytes of x per block).  Keeps the
    # double-buffered VMEM footprint well under every generation's default
    # scoped-VMEM limit, so no vmem_limit_bytes override is needed.
    # TODO(synk): extremely large B with tiny S*D (B*128*itemsize >> target) is
    # not additionally batch-tiled; unrealistic for this module.
    tsd = target_block_bytes // max(1, B * itemsize)
    tsd = max(128, (tsd // 128) * 128)                     # lane-aligned
    tsd = min(tsd, SD)
    grid = (pl.cdiv(SD, tsd),)

    out2 = pl.pallas_call(
        kernel,
        out_shape=out_shape,
        grid=grid,
        in_specs=[pl.BlockSpec((B, tsd), lambda s: (0, s)),      # x
                  pl.BlockSpec((1, tsd), lambda s: (0, s))]      # pe
                 + ([pl.BlockSpec((B, tsd), lambda s: (0, s))]   # mask
                    if apply_dropout else []),
        out_specs=pl.BlockSpec((B, tsd), lambda s: (0, s)),
        compiler_params=pltpu.CompilerParams(dimension_semantics=("parallel",)),
        cost_estimate=cost,
    )(*inputs)
    return out2.reshape(B, S, D)


class PositionalEncoding:
    """Thin stateful wrapper mirroring the PyTorch module."""

    def __init__(self, d_model, dropout, max_len=5000):
        self.d_model = d_model
        self.dropout_p = float(dropout)
        self.max_len = max_len
        self.pe = make_positional_encoding_table(max_len, d_model)

    def __call__(self, x, *, training=False, rng_key=None):
        return positional_encoding(x, self.pe, dropout_p=self.dropout_p,
                                   training=training, rng_key=rng_key)


if __name__ == "__main__":
    d_model = 32
    batch, seq = 2, 8
    max_len = 64
    dropout_p = 0.5

    key = jax.random.PRNGKey(0)
    x_key, drop_key = jax.random.split(key)
    x = jax.random.normal(x_key, (batch, seq, d_model), dtype=jnp.float32)

    module = PositionalEncoding(d_model, dropout_p, max_len=max_len)
    pe_slice = module.pe[:seq]
    ref_eval = x + pe_slice[None, :, :]

    # ---- Eval path (dropout = identity), single-block fast path ----
    out_eval = jax.block_until_ready(module(x, training=False))
    assert out_eval.shape == x.shape
    assert jnp.allclose(out_eval, ref_eval, atol=1e-6, rtol=1e-6)

    # ---- Training path (host-generated mask, fused apply in-kernel) ----
    out_train = jax.block_until_ready(module(x, training=True, rng_key=drop_key))
    keep = jax.random.bernoulli(drop_key, 1.0 - dropout_p,
                                (batch, seq * d_model)).reshape(batch, seq, d_model)
    ref_train = jnp.where(keep, ref_eval * (1.0 / (1.0 - dropout_p)), 0.0)
    assert out_train.shape == x.shape
    assert jnp.all(jnp.isfinite(out_train))
    assert jnp.allclose(out_train, ref_train, atol=1e-5, rtol=1e-5)

    # ---- Force the tiled (gridded) path on the same small input ----
    out_tiled_eval = jax.block_until_ready(positional_encoding(
        x, module.pe, dropout_p=dropout_p, training=False,
        fast_path_bytes=0, target_block_bytes=1024))
    assert jnp.allclose(out_tiled_eval, ref_eval, atol=1e-6, rtol=1e-6)

    out_tiled_train = jax.block_until_ready(positional_encoding(
        x, module.pe, dropout_p=dropout_p, training=True, rng_key=drop_key,
        fast_path_bytes=0, target_block_bytes=1024))
    assert jnp.allclose(out_tiled_train, ref_train, atol=1e-5, rtol=1e-5)

    print("KERNEL_OK")
</pallas_src>

<mosaic_0001>
module attributes {stable_mosaic.version = 11 : i64} {
  func.func @_pe_add_kernel(%arg0: memref<2x256xf32, #tpu.memory_space<vmem>>, %arg1: memref<1x256xf32, #tpu.memory_space<vmem>>, %arg2: memref<2x256xf32, #tpu.memory_space<vmem>>) attributes {dimension_semantics = [], scalar_prefetch = 0 : i64, scratch_operands = 0 : i64, tpu.core_type = #tpu.core_type<tc>} {
    %c0 = arith.constant 0 : index
    %c0_0 = arith.constant 0 : index
    %0 = vector.load %arg0[%c0, %c0_0] : memref<2x256xf32, #tpu.memory_space<vmem>>, vector<2x256xf32>
    %c0_1 = arith.constant 0 : index
    %c0_2 = arith.constant 0 : index
    %1 = vector.load %arg1[%c0_1, %c0_2] : memref<1x256xf32, #tpu.memory_space<vmem>>, vector<1x256xf32>
    %2 = vector.broadcast %1 : vector<1x256xf32> to vector<2x256xf32>
    %3 = arith.addf %0, %2 : vector<2x256xf32>
    %c0_3 = arith.constant 0 : index
    %c0_4 = arith.constant 0 : index
    %4 = vector.load %arg2[%c0_3, %c0_4] : memref<2x256xf32, #tpu.memory_space<vmem>>, vector<2x256xf32>
    tpu.vector_store %arg2[%c0_3, %c0_4], %3 {strides = array<i32>} : memref<2x256xf32, #tpu.memory_space<vmem>>, vector<2x256xf32>,
    return
  }
}

</mosaic_0001>

<bundles_post_ra>
// kernel: tpu_custom_call.1
= control target key start
LH: loop header
LB: loop body
LE: loop exit
PB: predicated region body
PF: predicated region fallthrough
CT: control target
= control target key end

     0   :  { %7 = vsyncpa [#allocation3], 0  ;;  %s157_s0 = inlined_call_operand.hbm [shape: f32[2,256], index: 0, kind: input, shape index: {}]   ;;  %s158_s1 = inlined_call_operand.vmem [shape: f32[1,256], index: 1, kind: input, shape index: {}]   ;;  %s159_s2 = inlined_call_operand.hbm [shape: f32[2,256], index: 2, kind: output, shape index: {}]  }
   0x1   :  { %8 = vsyncpa [#allocation4], 0  ;;  %s112_s9 = smov [#allocation2]   ;;  %s64_s13 = scalar_lea.hbm %s157_s0, 64 }
   0x2   :  { %s15_s10 = sshll.u32 %s112_s9, 4  ;;  %p65_p0 = scmp.ne.s32.totalorder %s157_s0, %s64_s13  ;;  %s16_s10 = int_to_ptr.vmem [resolvable:$true] %s15_s10 }
   0x3   :  { %p68_p1 = scmp.lt.u32.totalorder %s64_s13, %s157_s0 }
   0x5   :  { %p70_p2 = pnand %p68_p1, %p65_p0 }
   0x7   :  { %73 = shalt.err (!%p70_p2)
}
   0x8   :  { %s74_s18 = scalar_lea.vmem %s16_s10, 64  ;;  %p79_p4 = scmp.lt.s32.totalorder %s16_s10, %s16_s10 }
   0x9   :  { %p75_p3 = scmp.ne.s32.totalorder %s16_s10, %s74_s18  ;;  %p80_p5 = scmp.lt.s32.totalorder %s74_s18, %s74_s18 }
   0xb   :  { %p81_p6 = por %p80_p5, %p79_p4 }
   0xd   :  { %p82_p7 = pnand %p81_p6, %p75_p3 }
   0xf   :  { %85 = shalt.err (!%p82_p7)
}
  0x10   :  { %18 = dma.hbm_to_vmem [thread:$0]  %s157_s0, 64, %s16_s10, [#allocation3]  }
  0x11   :  { %108 = dma.done.wait [#allocation3], 64  }
  0x12   :  { %109 = vsyncadd [#allocation3], 4294967232  ;;  %v27_v0 = vlaneseq  ;;  %v113_v1 = vmov 1983009808   ;;  %v25_v7 = vld [vmem:[%s158_s1] sm:$0x3] }
  0x13   :  { %v37_v2 = vunpack.c.l.s4 %v113_v1  ;;  %v24_v12 = vld [vmem:[#allocation2] sm:$0xf]  ;;  %s114_s23 = smov [#allocation5]  }
  0x14   :  { %v28_v3 = vshrl.u32 %v27_v0, 7  ;;  %s52_s0 = sshll.u32 %s114_s23, 4  ;;  %s53_s0 = int_to_ptr.vmem [resolvable:$true] %s52_s0 }
  0x15   :  { %v38_v6 = vunpack.c.0.s8 %v37_v2  ;;  %s86_s24 = scalar_lea.vmem %s53_s0, 64  ;;  %p91_p9 = scmp.lt.s32.totalorder %s53_s0, %s53_s0 }
  0x16   :  { %v29_v4 = vsub.s32 0, %v28_v3  ;;  %v33_v5 = vsub.s32 1, %v28_v3  ;;  %p87_p8 = scmp.ne.s32.totalorder %s53_s0, %s86_s24  ;;  %p92_p10 = scmp.lt.s32.totalorder %s86_s24, %s86_s24 }
  0x17   :  { %v41_v10 = vsub.s32 %v38_v6, %v28_v3 }
  0x18   :  { %v30_v8 = vrot.slane %v25_v7, %v29_v4  ;;  %v34_v9 = vrot.slane %v25_v7, %v33_v5  ;;  %p93_p11 = por %p92_p10, %p91_p9 }
  0x1a   :  { %v35_v11 = vcombine.low %v30_v8, %v34_v9  ;;  %p94_p12 = pnand %p93_p11, %p87_p8 }
  0x1c   :  { %v42_v13 = vrot.slane %v35_v11, %v41_v10 }
  0x1e   :  { %v44_v14 = vadd.f32 %v42_v13, %v24_v12 }
  0x20   :  { %45 = vst [vmem:[#allocation5] sm:$0xf] %v44_v14 }
  0x21   :  { %97 = shalt.err (!%p94_p12)
}
  0x22   :  { %s98_s26 = scalar_lea.hbm %s159_s2, 64 }
  0x23   :  { %p99_p13 = scmp.ne.s32.totalorder %s159_s2, %s98_s26  ;;  %p102_p0 = scmp.lt.u32.totalorder %s98_s26, %s159_s2 }
  0x25   :  { %p104_p1 = pnand %p102_p0, %p99_p13 }
  0x27   :  { %107 = shalt.err (!%p104_p1)
}
  0x28   :  { %55 = dma.vmem_to_hbm [thread:$0]  %s53_s0, 64, %s159_s2, [#allocation4]  }
  0x29   :  { %110 = dma.done.wait [#allocation4], 64  }
  0x2a   :  { %111 = vsyncadd [#allocation4], 4294967232 }
  0x2b   :  { %59 = vsyncpa [#allocation3], 1 }
  0x2c   :  { %60 = vsyncpa [#allocation4], 1 }

</bundles_post_ra>
